<compile_context>
chip_gen: v7x
topology: tpu7x:2x2x1
jax: 0.10.0
libtpu: 0.0.40
codegen_flags: <defaults>
</compile_context>

<pallas_src>
import functools
import math

import jax
import jax.numpy as jnp
from jax.experimental import pallas as pl
from jax.experimental.pallas import tpu as pltpu

LN_EPS = 1e-12                      # DistilBERT LayerNorm eps
_INV_SQRT2 = 1.0 / math.sqrt(2.0)


# ----------------------------------------------------------------------------
# Per-generation sizing
# ----------------------------------------------------------------------------
@functools.lru_cache(maxsize=None)
def _vmem_limit():
    """Scoped-VMEM budget: ~75% of physical VMEM, capped at 100 MiB."""
    try:
        cap = int(pltpu.get_tpu_info().vmem_capacity_bytes)
    except Exception:
        cap = 64 * 1024 * 1024          # conservative (v7x-sized) fallback
    return min((cap * 3) // 4, 100 * 1024 * 1024)


@functools.lru_cache(maxsize=None)
def _row_tile_target():
    # Bigger activation tiles where VMEM is plentiful (v5e/v6e: 128 MiB).
    return 512 if _vmem_limit() >= 80 * 1024 * 1024 else 256


def _round_up(x, m):
    return ((x + m - 1) // m) * m


def _pick_row_tile(M, target):
    """Row (M=B*S) tile: multiple of 16 (bf16 sublanes), <= target, and at
    most ~M/2 once M > 32 so every row-grid gets >= 2 parallel steps."""
    if M <= 32:
        return _round_up(max(M, 8), 16)
    t = min(_round_up(target, 16), _round_up((M + 1) // 2, 16))
    return max(t, 16)


def _pick_seq_tile(S, target):
    """Largest multiple of 8 that divides S and is <= target (else S)."""
    if S <= target:
        return S
    for t in range(target - target % 8, 7, -8):
        if S % t == 0:
            return t
    return S


def _ln(x, g, b):
    mu = jnp.mean(x, axis=-1, keepdims=True)
    var = jnp.mean(jnp.square(x - mu), axis=-1, keepdims=True)
    return (x - mu) * jax.lax.rsqrt(var + LN_EPS) * g + b


# ----------------------------------------------------------------------------
# Row-tiled pallas_call helper (activations pipelined, weights VMEM-resident)
# ----------------------------------------------------------------------------
def _m_tiled_call(kernel, out_cols, out_dtype, *, tiled, resident,
                  flops=0, transcendentals=0):
    """Grid-tiled pallas_call over the row (M = B*S) dimension.

    `tiled`    : (M, K) activations, blocked as (tm, K), double-buffered.
    `resident` : weights / biases / LN params, whole-array VMEM residents
                 (single-buffered, DMA'd once per call).
    Awkward M is zero-padded up to a tile multiple (output sliced back).
    """
    M = tiled[0].shape[0]
    tm = _pick_row_tile(M, _row_tile_target())
    Mp = _round_up(M, tm)
    if Mp != M:
        tiled = [jnp.pad(a, ((0, Mp - M), (0, 0))) for a in tiled]
    grid = (Mp // tm,)

    multi = isinstance(out_cols, (tuple, list))
    cols = tuple(out_cols) if multi else (out_cols,)
    osize = jnp.dtype(out_dtype).itemsize
    bytes_accessed = int(
        sum(a.size * a.dtype.itemsize for a in tiled)
        + sum(a.size * a.dtype.itemsize for a in resident)
        + sum(Mp * c * osize for c in cols))

    in_specs = (
        [pl.BlockSpec((tm, a.shape[1]), lambda i: (i, 0)) for a in tiled]
        + [pl.BlockSpec(memory_space=pltpu.MemorySpace.VMEM) for _ in resident]
    )
    out_specs = tuple(pl.BlockSpec((tm, c), lambda i: (i, 0)) for c in cols)
    out_shape = tuple(jax.ShapeDtypeStruct((Mp, c), out_dtype) for c in cols)

    outs = pl.pallas_call(
        kernel,
        out_shape=out_shape if multi else out_shape[0],
        grid_spec=pltpu.PrefetchScalarGridSpec(
            num_scalar_prefetch=0,
            grid=grid,
            in_specs=in_specs,
            out_specs=out_specs if multi else out_specs[0],
        ),
        compiler_params=pltpu.CompilerParams(
            dimension_semantics=("parallel",),
            vmem_limit_bytes=_vmem_limit(),
        ),
        cost_estimate=pl.CostEstimate(
            flops=int(flops), transcendentals=int(transcendentals),
            bytes_accessed=bytes_accessed),
    )(*tiled, *resident)

    if not multi:
        outs = (outs,)
    if Mp != M:
        outs = tuple(o[:M] for o in outs)
    return outs if multi else outs[0]


def _full_call(kernel, out_shape, *args):
    # Tiny whole-array-in-VMEM call (classifier head only).
    return pl.pallas_call(
        kernel,
        out_shape=out_shape,
        in_specs=[pl.BlockSpec(memory_space=pltpu.MemorySpace.VMEM) for _ in args],
        out_specs=pl.BlockSpec(memory_space=pltpu.MemorySpace.VMEM),
    )(*args)


# ----------------------------------------------------------------------------
# Kernels
# ----------------------------------------------------------------------------
def _embed_ln_kernel(we_ref, pe_ref, g_ref, b_ref, o_ref):
    # (word_emb + pos_emb) -> LayerNorm; bf16 in, f32 math, bf16 out.
    x = we_ref[0].astype(jnp.float32) + pe_ref[...].astype(jnp.float32)
    o_ref[0] = _ln(x, g_ref[...], b_ref[...]).astype(o_ref.dtype)


def _qkv_kernel(x_ref, w_ref, b_ref, q_ref, k_ref, v_ref):
    # fused Q/K/V projection: x (tm, D) bf16 @ w (D, 3D) bf16 -> 3x (tm, D) bf16.
    acc = jnp.dot(x_ref[...], w_ref[...],
                  preferred_element_type=jnp.float32) + b_ref[...]
    d = q_ref.shape[1]
    q_ref[...] = acc[:, :d].astype(q_ref.dtype)
    k_ref[...] = acc[:, d:2 * d].astype(k_ref.dtype)
    v_ref[...] = acc[:, 2 * d:].astype(v_ref.dtype)


def _proj_add_ln_kernel(ctx_ref, res_ref, w_ref, b_ref, g_ref, bb_ref, o_ref):
    # attention output projection + residual + LayerNorm (fused epilogue)
    h = jnp.dot(ctx_ref[...], w_ref[...],
                preferred_element_type=jnp.float32) + b_ref[...]
    x = h + res_ref[...].astype(jnp.float32)
    o_ref[...] = _ln(x, g_ref[...], bb_ref[...]).astype(o_ref.dtype)


def _ffn_add_ln_kernel(x_ref, w1_ref, b1_ref, w2_ref, b2_ref, g_ref, bb_ref, o_ref):
    # FFN (w1 -> exact erf-GELU -> w2) + residual + LayerNorm (fused).
    h = jnp.dot(x_ref[...], w1_ref[...],
                preferred_element_type=jnp.float32) + b1_ref[...]
    h = 0.5 * h * (1.0 + jax.lax.erf(h * _INV_SQRT2))   # exact GELU (matches DistilBERT)
    h = jnp.dot(h.astype(w2_ref.dtype), w2_ref[...],
                preferred_element_type=jnp.float32) + b2_ref[...]
    x = h + x_ref[...].astype(jnp.float32)
    o_ref[...] = _ln(x, g_ref[...], bb_ref[...]).astype(o_ref.dtype)


def _mha_kernel(q_ref, k_ref, v_ref, bias_ref, o_ref, *, n_heads, d_head):
    # Head-fused layout: q (tq, H*Dh); full K/V (S, H*Dh) of one batch row are
    # VMEM-resident.  Per-head slicing stays in VMEM (no HBM head transposes);
    # single-pass softmax (no kv grid axis); lane-dense (tq, H*Dh) output store.
    # 1/sqrt(Dh) is pre-folded into the Q projection weights.
    q = q_ref[0]                            # (tq, D) bf16
    k = k_ref[0]                            # (S, D) bf16
    v = v_ref[0]                            # (S, D) bf16
    bias = bias_ref[0]                      # (1, S) additive mask, f32
    ctxs = []
    for h in range(n_heads):
        lo = h * d_head
        qh = q[:, lo:lo + d_head]
        kh = k[:, lo:lo + d_head]
        vh = v[:, lo:lo + d_head]
        s = jax.lax.dot_general(qh, kh, (((1,), (1,)), ((), ())),
                                preferred_element_type=jnp.float32)   # (tq, S)
        s = s + bias
        s = s - jnp.max(s, axis=-1, keepdims=True)
        p = jnp.exp(s)
        p = p * pl.reciprocal(jnp.sum(p, axis=-1, keepdims=True), approx=False)
        ctxs.append(jnp.dot(p.astype(vh.dtype), vh,
                            preferred_element_type=jnp.float32))       # (tq, Dh)
    o_ref[0] = jnp.concatenate(ctxs, axis=-1).astype(o_ref.dtype)


def _head_kernel(cls_ref, wc_ref, bc_ref, s_ref, wf_ref, bf_ref, o_ref):
    # classifier(cls) + fc_sentiment(sentiment_score)
    logits = jnp.dot(cls_ref[...], wc_ref[...],
                     preferred_element_type=jnp.float32) + bc_ref[...]
    o_ref[...] = logits + s_ref[...] * wf_ref[...] + bf_ref[...]


# ----------------------------------------------------------------------------
# Attention / embedding wrappers
# ----------------------------------------------------------------------------
def multi_head_attention(q, k, v, bias, n_heads):
    B, S, D = q.shape
    dh = D // n_heads
    tq = _pick_seq_tile(S, 256)
    grid = (B, S // tq)
    kern = functools.partial(_mha_kernel, n_heads=n_heads, d_head=dh)
    bytes_accessed = int((q.size + k.size + v.size) * 2 + bias.size * 4
                         + B * S * D * 2)
    return pl.pallas_call(
        kern,
        out_shape=jax.ShapeDtypeStruct((B, S, D), jnp.bfloat16),
        grid_spec=pltpu.PrefetchScalarGridSpec(
            num_scalar_prefetch=0,
            grid=grid,
            in_specs=[
                pl.BlockSpec((1, tq, D), lambda b, qi: (b, qi, 0)),
                pl.BlockSpec((1, S, D), lambda b, qi: (b, 0, 0)),   # full K per batch
                pl.BlockSpec((1, S, D), lambda b, qi: (b, 0, 0)),   # full V per batch
                pl.BlockSpec((1, 1, S), lambda b, qi: (b, 0, 0)),
            ],
            out_specs=pl.BlockSpec((1, tq, D), lambda b, qi: (b, qi, 0)),
        ),
        compiler_params=pltpu.CompilerParams(
            dimension_semantics=("parallel", "parallel"),
            vmem_limit_bytes=_vmem_limit(),
        ),
        cost_estimate=pl.CostEstimate(
            flops=int(4 * B * S * S * D),
            transcendentals=int(B * n_heads * S * S),
            bytes_accessed=bytes_accessed),
    )(q, k, v, bias)


def embed_layernorm(we, pos_emb, g, b):
    # we: (B, S, D) bf16 gathered word embeddings; pos_emb: (S, D) bf16 reused
    # for every batch row via the index_map (never materialized as (B, S, D)).
    B, S, D = we.shape
    ts = _pick_seq_tile(S, 512)
    grid = (B, S // ts)
    return pl.pallas_call(
        _embed_ln_kernel,
        out_shape=jax.ShapeDtypeStruct((B, S, D), jnp.bfloat16),
        grid_spec=pltpu.PrefetchScalarGridSpec(
            num_scalar_prefetch=0,
            grid=grid,
            in_specs=[
                pl.BlockSpec((1, ts, D), lambda bi, si: (bi, si, 0)),
                pl.BlockSpec((ts, D), lambda bi, si: (si, 0)),
                pl.BlockSpec(memory_space=pltpu.MemorySpace.VMEM),
                pl.BlockSpec(memory_space=pltpu.MemorySpace.VMEM),
            ],
            out_specs=pl.BlockSpec((1, ts, D), lambda bi, si: (bi, si, 0)),
        ),
        compiler_params=pltpu.CompilerParams(
            dimension_semantics=("parallel", "parallel"),
            vmem_limit_bytes=_vmem_limit(),
        ),
    )(we, pos_emb, g, b)


# ----------------------------------------------------------------------------
# Parameter init (deterministic, synthetic). Encoder matmul weights in bf16.
# ----------------------------------------------------------------------------
def init_params(key, *, vocab, max_pos, dim, n_heads, ffn_dim, n_layers, n_labels):
    dh = dim // n_heads
    scale = 1.0 / math.sqrt(dh)

    def nrm(k, shape):
        return jax.random.normal(k, shape, jnp.float32) * 0.02

    keys = iter(jax.random.split(key, 4 + 6 * n_layers))
    params = {
        "word_emb": nrm(next(keys), (vocab, dim)).astype(jnp.bfloat16),
        "pos_emb": nrm(next(keys), (max_pos, dim)).astype(jnp.bfloat16),
        "emb_ln_g": jnp.ones((1, dim), jnp.float32),
        "emb_ln_b": jnp.zeros((1, dim), jnp.float32),
        "cls_w": nrm(next(keys), (dim, n_labels)),      # classifier (in, out), f32
        "cls_b": jnp.zeros((1, n_labels), jnp.float32),
        "fc_sent_w": nrm(next(keys), (1, n_labels)),    # fc_sentiment (in, out), f32
        "fc_sent_b": jnp.zeros((1, n_labels), jnp.float32),
        "n_heads": n_heads,
        "layers": [],
    }
    for _ in range(n_layers):
        # NOTE: 1/sqrt(Dh) attention scale is folded into the Q projection
        # weights; re-apply this folding when importing real checkpoints.
        wq = nrm(next(keys), (dim, dim)) * scale
        wk = nrm(next(keys), (dim, dim))
        wv = nrm(next(keys), (dim, dim))
        layer = {
            "qkv_w": jnp.concatenate([wq, wk, wv], axis=1).astype(jnp.bfloat16),
            "qkv_b": jnp.zeros((1, 3 * dim), jnp.float32),
            "o_w": nrm(next(keys), (dim, dim)).astype(jnp.bfloat16),
            "o_b": jnp.zeros((1, dim), jnp.float32),
            "ln1_g": jnp.ones((1, dim), jnp.float32),
            "ln1_b": jnp.zeros((1, dim), jnp.float32),
            "ff1_w": nrm(next(keys), (dim, ffn_dim)).astype(jnp.bfloat16),
            "ff1_b": jnp.zeros((1, ffn_dim), jnp.float32),
            "ff2_w": nrm(next(keys), (ffn_dim, dim)).astype(jnp.bfloat16),
            "ff2_b": jnp.zeros((1, dim), jnp.float32),
            "ln2_g": jnp.ones((1, dim), jnp.float32),
            "ln2_b": jnp.zeros((1, dim), jnp.float32),
        }
        params["layers"].append(layer)
    return params


# ----------------------------------------------------------------------------
# Forward pass (mirrors SentimentDistilBERT.forward)
# ----------------------------------------------------------------------------
def sentiment_distilbert_forward(params, input_ids, attention_mask, sentiment_score,
                                 labels=None):
    B, S = input_ids.shape
    D = params["word_emb"].shape[1]
    H = params["n_heads"]
    F = params["layers"][0]["ff1_w"].shape[1]
    M = B * S

    # --- embeddings: bf16 gather (XLA glue) + fused add + LayerNorm kernel
    # TODO(synk): fuse the token-id gather via PrefetchScalarGridSpec + pl.Element
    we = params["word_emb"][input_ids]          # (B, S, D) bf16
    pe = params["pos_emb"][:S]                  # (S, D) bf16 (not broadcast)
    x2 = embed_layernorm(we, pe, params["emb_ln_g"], params["emb_ln_b"]).reshape(M, D)

    # additive attention-mask bias, computed once per forward: (B, 1, S) f32
    bias = ((attention_mask.astype(jnp.float32) - 1.0) * 1e9).reshape(B, 1, S)

    # --- transformer layers (post-LN, as in DistilBERT; dropout = identity in eval)
    for layer in params["layers"]:
        q2, k2, v2 = _m_tiled_call(
            _qkv_kernel, (D, D, D), jnp.bfloat16,
            tiled=[x2], resident=[layer["qkv_w"], layer["qkv_b"]],
            flops=2 * M * D * 3 * D)
        # (M, D) -> (B, S, D) and back are free reshapes: no head transposes in HBM.
        ctx = multi_head_attention(q2.reshape(B, S, D), k2.reshape(B, S, D),
                                   v2.reshape(B, S, D), bias, H)
        x2 = _m_tiled_call(
            _proj_add_ln_kernel, D, jnp.bfloat16,
            tiled=[ctx.reshape(M, D), x2],
            resident=[layer["o_w"], layer["o_b"], layer["ln1_g"], layer["ln1_b"]],
            flops=2 * M * D * D)
        x2 = _m_tiled_call(
            _ffn_add_ln_kernel, D, jnp.bfloat16,
            tiled=[x2],
            resident=[layer["ff1_w"], layer["ff1_b"], layer["ff2_w"],
                      layer["ff2_b"], layer["ln2_g"], layer["ln2_b"]],
            flops=4 * M * D * F, transcendentals=M * F)

    last_hidden = x2.reshape(B, S, D)
    cls = last_hidden[:, 0, :].astype(jnp.float32)                 # (B, D)

    # --- logits = classifier(cls) + fc_sentiment(sentiment_score.unsqueeze(1))
    n_labels = params["cls_w"].shape[1]
    logits = _full_call(
        _head_kernel,
        jax.ShapeDtypeStruct((B, n_labels), jnp.float32),
        cls, params["cls_w"], params["cls_b"],
        sentiment_score.reshape(B, 1).astype(jnp.float32),
        params["fc_sent_w"], params["fc_sent_b"])

    if labels is not None:
        # CrossEntropyLoss over (B, n_labels): tiny reduction, plain JAX glue
        logp = jax.nn.log_softmax(logits, axis=-1)
        loss = -jnp.mean(jnp.take_along_axis(logp, labels[:, None], axis=1))
        return {"loss": loss, "logits": logits}
    return {"logits": logits}


# ----------------------------------------------------------------------------
# Demo
# ----------------------------------------------------------------------------
if __name__ == "__main__":
    B, S = 2, 8
    VOCAB, MAX_POS, DIM, HEADS, FFN, LAYERS, LABELS = 100, 64, 32, 2, 64, 2, 3

    key = jax.random.PRNGKey(0)
    k_params, k_ids, k_sent = jax.random.split(key, 3)

    params = init_params(k_params, vocab=VOCAB, max_pos=MAX_POS, dim=DIM,
                         n_heads=HEADS, ffn_dim=FFN, n_layers=LAYERS,
                         n_labels=LABELS)

    input_ids = jax.random.randint(k_ids, (B, S), 0, VOCAB, dtype=jnp.int32)
    attention_mask = jnp.ones((B, S), jnp.int32).at[1, -2:].set(0)  # pad last 2 of row 1
    sentiment_score = jax.random.uniform(k_sent, (B,), jnp.float32, -1.0, 1.0)
    labels = jnp.array([0, 2], dtype=jnp.int32)

    out = sentiment_distilbert_forward(params, input_ids, attention_mask,
                                       sentiment_score, labels=labels)
    jax.block_until_ready(out["logits"])
    jax.block_until_ready(out["loss"])
    print("KERNEL_OK")
</pallas_src>

<mosaic_0001>
module attributes {stable_mosaic.version = 11 : i64} {
  func.func @_embed_ln_kernel(%arg0: i32, %arg1: i32, %arg2: memref<1x8x32xbf16, #tpu.memory_space<vmem>>, %arg3: memref<8x32xbf16, #tpu.memory_space<vmem>>, %arg4: memref<1x32xf32, #tpu.memory_space<vmem>>, %arg5: memref<1x32xf32, #tpu.memory_space<vmem>>, %arg6: memref<1x8x32xbf16, #tpu.memory_space<vmem>>) attributes {dimension_semantics = [#tpu.dimension_semantics<parallel>, #tpu.dimension_semantics<parallel>], iteration_bounds = array<i64: 2, 1>, scalar_prefetch = 0 : i64, scratch_operands = 0 : i64, tpu.core_type = #tpu.core_type<tc>, window_params = [{transform_indices = @transform_0, window_bounds = array<i64: 1, 8, 32>}, {transform_indices = @transform_1, window_bounds = array<i64: 8, 32>}, {pipeline_mode = #tpu.pipeline_mode<synchronous>, transform_indices = @transform_2, window_bounds = array<i64: 1, 32>}, {pipeline_mode = #tpu.pipeline_mode<synchronous>, transform_indices = @transform_3, window_bounds = array<i64: 1, 32>}, {transform_indices = @transform_4, window_bounds = array<i64: 1, 8, 32>}]} {
    %c0 = arith.constant 0 : index
    %c0_0 = arith.constant 0 : index
    %c0_1 = arith.constant 0 : index
    %0 = vector.load %arg2[%c0, %c0_0, %c0_1] : memref<1x8x32xbf16, #tpu.memory_space<vmem>>, vector<1x8x32xbf16>
    %1 = vector.shape_cast %0 : vector<1x8x32xbf16> to vector<8x32xbf16>
    %2 = arith.extf %1 : vector<8x32xbf16> to vector<8x32xf32>
    %c0_2 = arith.constant 0 : index
    %c0_3 = arith.constant 0 : index
    %3 = vector.load %arg3[%c0_2, %c0_3] : memref<8x32xbf16, #tpu.memory_space<vmem>>, vector<8x32xbf16>
    %4 = arith.extf %3 : vector<8x32xbf16> to vector<8x32xf32>
    %5 = arith.addf %2, %4 : vector<8x32xf32>
    %c0_4 = arith.constant 0 : index
    %c0_5 = arith.constant 0 : index
    %6 = vector.load %arg4[%c0_4, %c0_5] : memref<1x32xf32, #tpu.memory_space<vmem>>, vector<1x32xf32>
    %c0_6 = arith.constant 0 : index
    %c0_7 = arith.constant 0 : index
    %7 = vector.load %arg5[%c0_6, %c0_7] : memref<1x32xf32, #tpu.memory_space<vmem>>, vector<1x32xf32>
    %cst = arith.constant dense<0.000000e+00> : vector<8xf32>
    %8 = vector.multi_reduction <add>, %5, %cst [1] : vector<8x32xf32> to vector<8xf32>
    %9 = vector.shape_cast %8 : vector<8xf32> to vector<8x1xf32>
    %cst_8 = arith.constant 3.200000e+01 : f32
    %10 = vector.broadcast %cst_8 : f32 to vector<8x1xf32>
    %11 = arith.divf %9, %10 : vector<8x1xf32>
    %12 = vector.broadcast %11 : vector<8x1xf32> to vector<8x32xf32>
    %13 = arith.subf %5, %12 : vector<8x32xf32>
    %14 = arith.mulf %13, %13 : vector<8x32xf32>
    %cst_9 = arith.constant dense<0.000000e+00> : vector<8xf32>
    %15 = vector.multi_reduction <add>, %14, %cst_9 [1] : vector<8x32xf32> to vector<8xf32>
    %16 = vector.shape_cast %15 : vector<8xf32> to vector<8x1xf32>
    %cst_10 = arith.constant 3.200000e+01 : f32
    %17 = vector.broadcast %cst_10 : f32 to vector<8x1xf32>
    %18 = arith.divf %16, %17 : vector<8x1xf32>
    %19 = vector.broadcast %11 : vector<8x1xf32> to vector<8x32xf32>
    %20 = arith.subf %5, %19 : vector<8x32xf32>
    %cst_11 = arith.constant 9.99999996E-13 : f32
    %21 = vector.broadcast %cst_11 : f32 to vector<8x1xf32>
    %22 = arith.addf %18, %21 : vector<8x1xf32>
    %23 = math.rsqrt %22 : vector<8x1xf32>
    %24 = vector.broadcast %23 : vector<8x1xf32> to vector<8x32xf32>
    %25 = arith.mulf %20, %24 : vector<8x32xf32>
    %26 = vector.broadcast %6 : vector<1x32xf32> to vector<8x32xf32>
    %27 = arith.mulf %25, %26 : vector<8x32xf32>
    %28 = vector.broadcast %7 : vector<1x32xf32> to vector<8x32xf32>
    %29 = arith.addf %27, %28 : vector<8x32xf32>
    %30 = arith.truncf %29 : vector<8x32xf32> to vector<8x32xbf16>
    %c0_12 = arith.constant 0 : index
    %c0_13 = arith.constant 0 : index
    %c0_14 = arith.constant 0 : index
    %31 = vector.load %arg6[%c0_12, %c0_13, %c0_14] : memref<1x8x32xbf16, #tpu.memory_space<vmem>>, vector<1x8x32xbf16>
    %32 = vector.shape_cast %31 : vector<1x8x32xbf16> to vector<8x32xbf16>
    %33 = vector.shape_cast %30 : vector<8x32xbf16> to vector<1x8x32xbf16>
    tpu.vector_store %arg6[%c0_12, %c0_13, %c0_14], %33 {strides = array<i32>} : memref<1x8x32xbf16, #tpu.memory_space<vmem>>, vector<1x8x32xbf16>,
    return
  }
  func.func @transform_0(%arg0: i32, %arg1: i32) -> (i32, i32, i32) {
    %c0_i32 = arith.constant 0 : i32
    %c0_i32_0 = arith.constant 0 : i32
    return %arg0, %arg1, %c0_i32 : i32, i32, i32
  }
  func.func @transform_1(%arg0: i32, %arg1: i32) -> (i32, i32) {
    %c0_i32 = arith.constant 0 : i32
    %c0_i32_0 = arith.constant 0 : i32
    return %arg1, %c0_i32 : i32, i32
  }
  func.func @transform_2(%arg0: i32, %arg1: i32) -> (i32, i32) {
    %c0_i32 = arith.constant 0 : i32
    %c0_i32_0 = arith.constant 0 : i32
    %c0_i32_1 = arith.constant 0 : i32
    return %c0_i32, %c0_i32_0 : i32, i32
  }
  func.func @transform_3(%arg0: i32, %arg1: i32) -> (i32, i32) {
    %c0_i32 = arith.constant 0 : i32
    %c0_i32_0 = arith.constant 0 : i32
    %c0_i32_1 = arith.constant 0 : i32
    return %c0_i32, %c0_i32_0 : i32, i32
  }
  func.func @transform_4(%arg0: i32, %arg1: i32) -> (i32, i32, i32) {
    %c0_i32 = arith.constant 0 : i32
    %c0_i32_0 = arith.constant 0 : i32
    return %arg0, %arg1, %c0_i32 : i32, i32, i32
  }
}

</mosaic_0001>

<bundles_post_ra>
// kernel: tpu_custom_call.1
= control target key start
LH: loop header
LB: loop body
LE: loop exit
PB: predicated region body
PF: predicated region fallthrough
CT: control target
= control target key end

     0   :  { %9 = vsyncpa [#allocation3], 0  ;;  %s888_s0 = inlined_call_operand.hbm [shape: bf16[2,8,32], index: 0, kind: input, shape index: {}]   ;;  %s889_s1 = inlined_call_operand.hbm [shape: bf16[8,32], index: 1, kind: input, shape index: {}]   ;;  %s890_s2 = inlined_call_operand.vmem [shape: f32[1,32], index: 2, kind: input, shape index: {}]   ;;  %s891_s3 = inlined_call_operand.vmem [shape: f32[1,32], index: 3, kind: input, shape index: {}]   ;;  %s892_s4 = inlined_call_operand.hbm [shape: bf16[2,8,32], index: 4, kind: output, shape index: {}]  }
   0x1   :  { %11 = vsyncpa [#allocation3 + $0x1], 0 }
   0x2   :  { %12 = vsyncpa [#allocation6], 0 }
   0x3   :  { %13 = vsyncpa [#allocation4], 0 }
   0x4   :  { %15 = vsyncpa [#allocation4 + $0x1], 0  ;;  %s662_s15 = smov 0   ;;  %s664_s16 = smov 0  }
   0x5   :  { %s666_s17 = smov 0   ;;  %s668_s18 = smov 0  }
   0x6   :  { %s670_s19 = smov 0   ;;  %s672_s20 = smov 0  }
   0x7 LB: > { %s396_s21 = sadd.s32 4294967295, %s632_s20   ;;  %s397_s22 = sadd.s32 4294967294, %s632_s20   ;;  %s632_s20 = sphi %s672_s20, %s21_s20   ;;  %s628_s19 = sphi %s670_s19, %s917_s19   ;;  %s624_s18 = sphi %s668_s18, %s916_s18   ;;  %s620_s17 = sphi %s666_s17, %s915_s17   ;;  %s616_s16 = sphi %s664_s16, %s914_s16   ;;  %s612_s15 = sphi %s662_s15, %s913_s15  }
   0x8   : > { %p55_p0 = scmp.ne.s32.totalorder %s616_s16, %s612_s15  ;;  %p696_p1 = scmp.eq.s32.totalorder %s396_s21, 0 }
   0x9   : > { %p700_p2 = scmp.eq.s32.totalorder %s396_s21, 1  ;;  %p155_p3 = scmp.eq.s32.totalorder %s397_s22, 1 }
   0xa   : > { %s897_s23 = scalar_select %p696_p1, 1, 0 }
   0xb   : > { %s898_s24 = scalar_select %p700_p2, 1, 0 }
   0xc   : > { %p706_p4 = por %p696_p1, %p55_p0  ;;  %p398_p5 = scmp.ge.s32.totalorder %s632_s20, 1 }
   0xd   : > { %p711_p6 = por %p155_p3, %p55_p0  ;;  %p162_p7 = scmp.lt.s32.totalorder %s632_s20, 3 }
   0xe   : > { %s899_s25 = scalar_select %p706_p4, 1, 0 }
   0xf   : > { %s900_s26 = scalar_select %p711_p6, 1, 0 }
  0x10   : > { %p716_p8 = pnand %p398_p5, %p162_p7  ;;  %s634_s28 = smov [#allocation5]  }
  0x11   : > { %s177_s29 = sshll.u32 %s634_s28, 4  ;;  %s33_s5 = sadd.s32 1, %s628_s19  ;;  %s178_s29 = int_to_ptr.vmem [resolvable:$true] %s177_s29 }
  0x12   : > { %s901_s27 = scalar_select %p716_p8, 1, 0 }
  0x13   : > { %p421_p10 = pneg %p716_p8  ;;  %s42_s6 = sadd.s32 1, %s620_s17 }
  0x14   : > { %p731_p12 = scmp.ge.s32.totalorder %s33_s5, 2  ;;  %s488_s10 = scalar_lea.hbm %s889_s1, 64 }
  0x15   : > { %p725_p11 = pnand %p421_p10, %p696_p1  ;;  %p489_p13 = scmp.ne.s32.totalorder %s889_s1, %s488_s10 }
  0x16   : > { %s903_s7 = scalar_select %p731_p12, 1, 0 }
  0x17   : > { %p490_p0 = pneg %p725_p11  ;;  %p495_p7 = scmp.lt.u32.totalorder %s488_s10, %s889_s1 }
  0x19   : > { %p491_p3 = pnand %p490_p0, %p489_p13 }
  0x1b   : > { %p492_p5 = pneg %p491_p3 }
  0x1d   : > { %p497_p10 = pnand %p495_p7, %p492_p5 }
  0x1f   : > { %500 = shalt.err (!%p497_p10)
}
  0x20   : > { %s501_s21 = scalar_lea.vmem %s178_s29, 64  ;;  %p509_p4 = scmp.lt.s32.totalorder %s178_s29, %s178_s29 }
  0x21   : > { %p502_p9 = scmp.ne.s32.totalorder %s178_s29, %s501_s21  ;;  %p510_p8 = scmp.lt.s32.totalorder %s501_s21, %s501_s21 }
  0x23   : > { %p504_p6 = pnand %p502_p9, %p490_p0  ;;  %p511_p2 = por %p510_p8, %p509_p4 }
  0x25   : > { %p505_p1 = pneg %p504_p6 }
  0x27   : > { %p512_p12 = pnand %p511_p2, %p505_p1 }
  0x29   : > { %515 = shalt.err (!%p512_p12)
}
  0x2a   : > { %424 = dma.hbm_to_vmem [thread:$0]  (!%p725_p11), %s889_s1, 64, %s178_s29, [#allocation6]  }
  0x2b   : > { %p904_p4 = scmp.ne.s32.totalorder %s903_s7, 0  ;;  %p49_p1 = scmp.ne.s32.totalorder %s620_s17, %s616_s16 }
  0x2c   : > { %p50_p2 = scmp.eq.s32.totalorder %s632_s20, 0  ;;  %p434_p6 = scmp.lt.s32.totalorder %s632_s20, 2 }
  0x2d   : > { %s919_s5 = smov (%p904_p4, %s33_s5), 0  ;;  %p905_p12 = scmp.ne.s32.totalorder %s898_s24, 0 }
  0x2e   : > { %s37_s30 = ssub.s32 %s628_s19, %s919_s5  ;;  %p51_p9 = por %p50_p2, %p49_p1 }
  0x2f   : > { %p40_p8 = scmp.eq.s32.totalorder %s37_s30, 0  ;;  %p763_p13 = por %p905_p12, %p49_p1 }
  0x30   : > { %s194_s9 = sand.u32 1, %s620_s17   ;;  %s402_s7 = sshll.u32 %s628_s19, 6 }
  0x31   : > { %s771_s10 = scalar_select %p40_p8, %s620_s17, %s42_s6  }
  0x32   : > { %s401_s29 = sshll.u32 %s194_s9, 2  ;;  %s777_s13 = scalar_lea.hbm %s888_s0, %s402_s7 }
  0x33   : > { %s198_s24 = scalar_lea.vmem [#allocation2], %s401_s29  ;;  %p781_p11 = pnand %p434_p6, %p51_p9 }
  0x34   : > { %s206_s14 = sshll.u32 %s198_s24, 4  ;;  %s195_s6 = scalar_lea.sflag [#allocation3], %s194_s9  ;;  %s779_s14 = int_to_ptr.vmem [resolvable:$true] %s206_s14 }
  0x35   : > { %s516_s22 = scalar_lea.hbm %s777_s13, 64  ;;  %p518_p3 = pneg %p781_p11 }
  0x36   : > { %p517_p0 = scmp.ne.s32.totalorder %s777_s13, %s516_s22  ;;  %s521_s29 = scalar_lea.hbm %s888_s0, 128 }
  0x37   : > { %p522_p10 = scmp.lt.u32.totalorder %s777_s13, %s888_s0  ;;  %p523_p4 = scmp.lt.u32.totalorder %s521_s29, %s516_s22 }
  0x38   : > { %p519_p5 = pnand %p518_p3, %p517_p0  ;;  %p525_p2 = scmp.lt.u32.totalorder %s516_s22, %s777_s13 }
  0x39   : > { %p524_p1 = por %p523_p4, %p522_p10 }
  0x3a   : > { %p520_p7 = pneg %p519_p5 }
  0x3b   : > { %p526_p6 = por %p525_p2, %p524_p1 }
  0x3d   : > { %p527_p8 = pnand %p526_p6, %p520_p7 }
  0x3f   : > { %530 = shalt.err (!%p527_p8)
}
  0x40   : > { %s531_s9 = scalar_lea.vmem %s779_s14, 64  ;;  %s635_s12 = smov [#allocation2]  }
  0x41   : > { %p532_p9 = scmp.ne.s32.totalorder %s779_s14, %s531_s9  ;;  %s536_s24 = sshll.u32 %s635_s12, 4  ;;  %s537_s24 = int_to_ptr.vmem [resolvable:$false] %s536_s24 }
  0x42   : > { %s538_s28 = scalar_lea.vmem %s537_s24, 128  ;;  %p539_p5 = scmp.lt.s32.totalorder %s779_s14, %s537_s24 }
  0x43   : > { %p534_p12 = pnand %p532_p9, %p518_p3  ;;  %p540_p10 = scmp.lt.s32.totalorder %s538_s28, %s531_s9 }
  0x45   : > { %p535_p0 = pneg %p534_p12  ;;  %p541_p4 = por %p540_p10, %p539_p5 }
  0x47   : > { %p542_p1 = pnand %p541_p4, %p535_p0 }
  0x49   : > { %545 = shalt.err (!%p542_p1)
}
  0x4a   : > { %428 = dma.hbm_to_vmem [thread:$0]  (!%p781_p11), %s777_s13, 64, %s779_s14, %s195_s6  }
  0x4b   : > { %p908_p7 = scmp.ne.s32.totalorder %s901_s27, 0 }
  0x4c   : > { %s813_s22 = sand.u32 (!%p908_p7), 1, %s616_s16   ;;  %p909_p3 = scmp.ne.s32.totalorder (!%p908_p7), %s899_s25, 0 }
  0x4d   : > { %215 = sbr.rel (%p908_p7) target bundleno = 422 (0x1a6), region = 36  ;;  %s404_s30 = sshll.u32 (!%p908_p7), %s813_s22, 2 }
  0x4e   : > { %s218_s29 = scalar_lea.sflag (!%p908_p7), [#allocation3], %s813_s22  ;;  %s221_s7 = scalar_lea.vmem (!%p908_p7), [#allocation2], %s404_s30 }
  0x54   : > { %599 = dma.done.wait (%p909_p3), %s218_s29, 64  }
  0x55   : > { %601 = vsyncadd (%p909_p3), %s218_s29, 4294967232  ;;  %p910_p11 = scmp.ne.s32.totalorder %s897_s23, 0 }
  0x57   : > { %603 = dma.done.wait (%p910_p11), [#allocation6], 64  }
  0x58   : > { %605 = vsyncadd (%p910_p11), [#allocation6], 4294967232  ;;  %v250_v0 = vld [vmem:[%s221_s7] sm:$0xf]  ;;  %v252_v1 = vld [vmem:[#allocation5] sm:$0xf] }
  0x59   : > { %v251_v2 = vunpack.c.l.bf16 %v250_v0  ;;  %v253_v3 = vunpack.c.l.bf16 %v252_v1  ;;  %vm257_vm0 = vcmask 261120   ;;  %v407_v15 = vld [vmem:[%s890_s2] ss:$0 sm:$0xff]  ;;  %s410_s14 = sshll.u32 %s624_s18, 6  ;;  %s249_s21 = scalar_lea.vmem [#allocation7], %s404_s30  ;;  %vm287_vm1 = vcmask 257024  }
  0x5a   : > { %v408_v17 = vld [vmem:[%s891_s3] ss:$0 sm:$0xff]  ;;  %s304_s6 = sshll.u32 %s249_s21, 4  ;;  %s839_s12 = scalar_lea.hbm %s892_s4, %s410_s14  ;;  %s841_s6 = int_to_ptr.vmem [resolvable:$true] %s304_s6 }
  0x5b   : > { %v254_v4 = vadd.f32 %v253_v3, %v251_v2  ;;  %s290_s24 = scalar_lea.sflag [#allocation4], %s813_s22  ;;  %s546_s28 = scalar_lea.vmem %s841_s6, 64 }
  0x5c   : > { %p547_p2 = scmp.ne.s32.totalorder %s841_s6, %s546_s28  ;;  %s636_s18 = smov [#allocation7]  }
  0x5d   : > { %v258_v5 = vsel %vm257_vm0, %v254_v4, 0.0  ;;  %s550_s30 = sshll.u32 %s636_s18, 4  ;;  %s551_s30 = int_to_ptr.vmem [resolvable:$false] %s550_s30 }
  0x5e   : > { %259 = vadd.xlane.f32.xlu0 %v258_v5  ;;  %p548_p6 = pnand %p547_p2, %p763_p13  ;;  %s552_s29 = scalar_lea.vmem %s551_s30, 128 }
  0x5f   : > { %p553_p9 = scmp.lt.s32.totalorder %s841_s6, %s551_s30  ;;  %p554_p12 = scmp.lt.s32.totalorder %s552_s29, %s546_s28 }
  0x60   : > { %p549_p8 = pneg %p548_p6 }
  0x61   : > { %p555_p0 = por %p554_p12, %p553_p9 }
  0x63   : > { %p556_p5 = pnand %p555_p0, %p549_p8 }
  0xeb   : > { %v260_v6 = vpop.xlane.xlu0 %259 }
  0xec   : > { %v262_v7 = vmul.f32 0.03125, %v260_v6 }
  0xee   : > { %v263_v8 = vsub.f32 %v254_v4, %v262_v7 }
  0xf0   : > { %v264_v9 = vmul.f32 %v263_v8, %v263_v8 }
  0xf2   : > { %v265_v10 = vsel %vm257_vm0, %v264_v9, 0.0 }
  0xf3   : > { %266 = vadd.xlane.f32.xlu0 %v265_v10 }
 0x180   : > { %v267_v11 = vpop.xlane.xlu0 %266 }
 0x181   : > { %v268_v12 = vmul.f32 0.03125, %v267_v11 }
 0x183   : > { %v269_v13 = vadd.f32 1e-12, %v268_v12 }
 0x185   : > { %486 = vrsqrt.f32 %v269_v13 }
 0x18f   : > { %v487_v14 = vpop.eup %486 }
 0x190   : > { %v271_v16 = vmul.f32 %v487_v14, %v263_v8 }
 0x192   : > { %v278_v18 = vmul.f32 %v407_v15, %v271_v16 }
 0x194   : > { %v285_v19 = vadd.f32 %v408_v17, %v278_v18 }
 0x196   : > { %v286_v20 = vpack.c.bf16 %v285_v19, %v285_v19 }
 0x198   : > { %288 = vst.msk [vmem:[%s249_s21] sm:$0xf] %vm287_vm1, %v286_v20 }
 0x199   : > { %559 = shalt.err (!%p556_p5)
}
 0x19a   : > { %s560_s22 = scalar_lea.hbm %s839_s12, 64  ;;  %s564_s25 = scalar_lea.hbm %s892_s4, 128 }
 0x19b   : > { %p561_p10 = scmp.ne.s32.totalorder %s839_s12, %s560_s22  ;;  %p565_p7 = scmp.lt.u32.totalorder %s839_s12, %s892_s4 }
 0x19c   : > { %p566_p3 = scmp.lt.u32.totalorder %s564_s25, %s560_s22  ;;  %p568_p2 = scmp.lt.u32.totalorder %s560_s22, %s839_s12 }
 0x19d   : > { %p562_p4 = pnand %p561_p10, %p763_p13 }
 0x19e   : > { %p567_p11 = por %p566_p3, %p565_p7 }
 0x19f   : > { %p563_p1 = pneg %p562_p4 }
 0x1a0   : > { %p569_p6 = por %p568_p2, %p567_p11 }
 0x1a2   : > { %p570_p8 = pnand %p569_p6, %p563_p1 }
 0x1a4   : > { %573 = shalt.err (!%p570_p8)
}
 0x1a5   : > { %419 = dma.vmem_to_hbm [thread:$0]  (%p763_p13), %s841_s6, 64, %s839_s12, %s290_s24  }
 0x1a6 PF: > { %s316_s14 = sand.u32 1, %s612_s15   ;;  %p911_p9 = scmp.ne.s32.totalorder %s900_s26, 0 }
 0x1a7   : > { %p912_p12 = scmp.ge.s32.totalorder %s632_s20, 2  ;;  %s317_s21 = scalar_lea.sflag [#allocation4], %s316_s14 }
 0x1a9   : > { %p430_p0 = pnand %p912_p12, %p911_p9 }
 0x1ab   : > { %607 = dma.done.wait (!%p430_p0), %s317_s21, 64  }
 0x1ac   : > { %609 = vsyncadd (!%p430_p0), %s317_s21, 4294967232  ;;  %s21_s20 = sadd.s32 1, %s632_s20   ;;  %s913_s15 = smov %s616_s16 }
 0x1ad   : > { %p18_p5 = scmp.ge.s32.totalorder %s21_s20, 4   ;;  %s914_s16 = smov %s620_s17 }
 0x1ae   : > { %s915_s17 = smov %s771_s10  ;;  %s916_s18 = smov %s628_s19 }
 0x1af   : > { %s917_s19 = smov %s919_s5  ;;  %20 = sbr.rel (!%p18_p5) target bundleno = 7 (0x7), region = 86 }
 0x1b6   :  { %322 = vsyncpa [#allocation3], 1 }
 0x1b7   :  { %324 = vsyncpa [#allocation3 + $0x1], 1 }
 0x1b8   :  { %325 = vsyncpa [#allocation6], 1 }
 0x1b9   :  { %326 = vsyncpa [#allocation4], 1 }
 0x1ba   :  { %328 = vsyncpa [#allocation4 + $0x1], 1 }

</bundles_post_ra>
